<compile_context>
chip_gen: v7x
topology: tpu7x:2x2x1
jax: 0.10.0
libtpu: 0.0.40
codegen_flags: <defaults>
</compile_context>

<pallas_src>
import jax
import jax.numpy as jnp
import numpy as np
from jax.experimental import pallas as pl
from jax.experimental.pallas import tpu as pltpu


def _dft_matrix(n):
    """Real/imag parts of the n x n DFT matrix F[u,k] = exp(-2*pi*i*u*k/n)."""
    k = np.arange(n)
    ang = -2.0 * np.pi * np.outer(k, k) / float(n)
    return np.cos(ang).astype(np.float32), np.sin(ang).astype(np.float32)


def _device_kind():
    try:
        return jax.devices()[0].device_kind.lower()
    except Exception:
        return ""


def _mxu_width():
    kind = _device_kind()
    # v5e has a 128-wide MXU; treat v4/v5p/v6e/v7x as 256-wide.
    if ("v5e" in kind or "v5 lite" in kind or "v5litepod" in kind) and "v5p" not in kind:
        return 128
    return 256


def _num_tensorcores():
    kind = _device_kind()
    # Parts with 2 TensorCores per device (megacore / v7x).
    if "v4" in kind or "v5p" in kind or "v7" in kind:
        return 2
    return 1


def _choose_layout(P, H, W, in_itemsize):
    """Pick (GM, CH, W_pad): GM plane-chunks stacked on sublanes, CH planes per
    chunk along lanes (each plane's lane stripe zero-padded W -> W_pad)."""
    mxuw = _mxu_width()

    if W >= 128:
        w_pad = -(-W // 128) * 128                 # round up to a lane multiple
        ch = 1
    else:
        w_pad = 1 << (W - 1).bit_length()          # next power of two >= W
        q = max(1, 128 // w_pad)                   # min planes/chunk for 128 lanes
        ch = max(q, mxuw // w_pad)                 # lane width target = MXU width
        ch = min(ch, q * (-(-P // q)))             # don't pad far past real planes

    n_chunks = -(-P // ch)
    gm = max(1, min(max(1, 128 // H), n_chunks))   # target M = GM*H ~ 128

    # VMEM budget (item 6): include kron operands + temporaries, shrink GM if needed.
    def est(gm_):
        L = ch * w_pad
        mh = gm_ * H
        x_blk = 2 * 2 * mh * L * in_itemsize       # x1 + x2, double-buffered
        a_blk = 2 * (2 * mh) * mh * 2              # bf16 row operator, 2 buffers
        b_blk = 2 * 3 * L * L * 2                  # bf16 kron operators, 2 buffers
        acc = mh * L * 4
        tmp = 8 * mh * L * 4                       # f32 matmul results / temporaries
        return x_blk + a_blk + b_blk + acc + tmp

    while gm > 1 and est(gm) > (24 << 20):
        gm = max(1, gm // 2)

    return gm, ch, w_pad


def _make_kernel(inv_total, mh):
    inv_total = np.float32(inv_total)

    def kernel(x1_ref, x2_ref, a_ref, br_ref, bi_ref, bs_ref, out_ref, acc_ref):
        s = pl.program_id(1)

        @pl.when(s == 0)
        def _init():
            acc_ref[...] = jnp.zeros_like(acc_ref)

        # FFT is linear: transform the difference once (cast in-kernel).
        d = (x1_ref[...].astype(jnp.float32)
             - x2_ref[...].astype(jnp.float32)).astype(jnp.bfloat16)

        def mm(a, b):
            return jnp.dot(a, b, preferred_element_type=jnp.float32)

        # Fused row transform: [T_re; T_im] = [kron(I_GM,FH_re); kron(I_GM,FH_im)] @ D.
        t = mm(a_ref[...], d)                      # (2*MH, L) f32
        t_re = t[:mh, :]
        t_im = t[mh:, :]

        tr = t_re.astype(jnp.bfloat16)
        ti = t_im.astype(jnp.bfloat16)
        ts = (t_re + t_im).astype(jnp.bfloat16)

        # Column transform (shared block-diagonal kron RHS), 3-matmul complex product.
        m1 = mm(tr, br_ref[...])
        m2 = mm(ti, bi_ref[...])
        m3 = mm(ts, bs_ref[...])
        y_re = m1 - m2
        y_im = m3 - m1 - m2

        # Elementwise partial accumulation (VPU); single reduction at group end.
        acc_ref[...] += jnp.abs(y_re) + jnp.abs(y_im)

        @pl.when(s == pl.num_programs(1) - 1)
        def _finalize():
            total = jnp.sum(acc_ref[...]) * inv_total
            out_ref[...] = jnp.full(out_ref.shape, total, dtype=jnp.float32)

    return kernel


def fft_loss(img1, img2):
    """Pallas implementation of FFTLoss.forward for NCHW float inputs."""
    assert img1.shape == img2.shape and img1.ndim == 4
    N, C, H, W = img1.shape
    P = N * C
    total_elems = N * C * H * W * 2                # stacked (real, imag) element count
    in_itemsize = jnp.dtype(img1.dtype).itemsize

    GM, CH, W_pad = _choose_layout(P, H, W, in_itemsize)
    L = CH * W_pad                                 # lane width per grid step
    MH = GM * H                                    # sublane height per grid step

    planes_per_step = GM * CH
    nblocks = -(-P // planes_per_step)
    G = 2 if (_num_tensorcores() >= 2 and nblocks >= 2) else 1
    S = -(-nblocks // G)
    P_pad = G * S * planes_per_step

    def prep(x):
        # (N,C,H,W) -> (MH, G*S*L): chunk m in rows [m*H,(m+1)*H), super-block
        # b = g*S+s in lane columns [b*L,(b+1)*L), plane j of the chunk in the
        # j-th W_pad-wide lane stripe.  Padded planes / columns are zero and
        # contribute exactly 0 to the loss (both inputs padded identically).
        x = x.reshape(P, H, W)
        x = jnp.pad(x, ((0, P_pad - P), (0, 0), (0, W_pad - W)))
        x = x.reshape(G * S, GM, CH, H, W_pad)
        x = jnp.transpose(x, (1, 3, 0, 2, 4))      # (GM, H, G*S, CH, W_pad)
        return x.reshape(MH, G * S * L)

    x1 = prep(img1)
    x2 = prep(img2)

    # DFT operators (bf16 -> single-pass MXU matmuls).  Grid-invariant, so the
    # pipeline only DMAs them once.
    fh_re, fh_im = _dft_matrix(H)
    fw_re, fw_im = _dft_matrix(W)

    eye_gm = np.eye(GM, dtype=np.float32)
    a_np = np.concatenate(
        [np.kron(eye_gm, fh_re), np.kron(eye_gm, fh_im)], axis=0)   # (2*MH, MH)

    bw_re = np.zeros((W_pad, W_pad), np.float32)
    bw_im = np.zeros((W_pad, W_pad), np.float32)
    bw_re[:W, :W] = fw_re.T
    bw_im[:W, :W] = fw_im.T
    eye_ch = np.eye(CH, dtype=np.float32)
    b_re_np = np.kron(eye_ch, bw_re)                                # (L, L)
    b_im_np = np.kron(eye_ch, bw_im)
    b_sum_np = b_re_np + b_im_np

    a_op = jnp.asarray(a_np, dtype=jnp.bfloat16)
    b_re = jnp.asarray(b_re_np, dtype=jnp.bfloat16)
    b_im = jnp.asarray(b_im_np, dtype=jnp.bfloat16)
    b_sum = jnp.asarray(b_sum_np, dtype=jnp.bfloat16)

    x_spec = pl.BlockSpec((MH, L), lambda g, s: (0, g * S + s))
    a_spec = pl.BlockSpec((2 * MH, MH), lambda g, s: (0, 0))
    b_spec = pl.BlockSpec((L, L), lambda g, s: (0, 0))

    out = pl.pallas_call(
        _make_kernel(1.0 / total_elems, MH),
        out_shape=jax.ShapeDtypeStruct((G, 1, 1), jnp.float32),
        grid_spec=pltpu.PrefetchScalarGridSpec(
            num_scalar_prefetch=0,
            grid=(G, S),
            in_specs=[x_spec, x_spec, a_spec, b_spec, b_spec, b_spec],
            out_specs=pl.BlockSpec((1, 1, 1), lambda g, s: (g, 0, 0)),
            scratch_shapes=[pltpu.VMEM((MH, L), jnp.float32)],
        ),
        compiler_params=pltpu.CompilerParams(
            dimension_semantics=("parallel", "arbitrary")),
    )(x1, x2, a_op, b_re, b_im, b_sum)

    return jnp.sum(out)


def _reference(img1, img2):
    f1 = jnp.fft.fft2(img1.astype(jnp.float32), axes=(-2, -1))
    f2 = jnp.fft.fft2(img2.astype(jnp.float32), axes=(-2, -1))
    s1 = jnp.stack([f1.real, f1.imag], -1)
    s2 = jnp.stack([f2.real, f2.imag], -1)
    return jnp.mean(jnp.abs(s1 - s2))


if __name__ == "__main__":
    key = jax.random.PRNGKey(0)

    # Primary NCHW shape implied by the module + a second shape exercising the
    # multi-step / padded-plane / padded-W (non-pow2 width) paths.
    for shape in [(2, 4, 16, 16), (4, 25, 16, 24)]:
        key, k1, k2 = jax.random.split(key, 3)
        img1 = jax.random.normal(k1, shape, dtype=jnp.float32)
        img2 = jax.random.normal(k2, shape, dtype=jnp.float32)

        loss = fft_loss(img1, img2)
        jax.block_until_ready(loss)

        ref = _reference(img1, img2)
        # bf16 twiddles / intermediates bound accuracy to ~1e-2 relative.
        np.testing.assert_allclose(np.asarray(loss), np.asarray(ref),
                                   rtol=3e-2, atol=1e-3)

    print("KERNEL_OK")
</pallas_src>

<mosaic_0001>
module attributes {stable_mosaic.version = 11 : i64} {
  func.func @kernel(%arg0: i32, %arg1: i32, %arg2: memref<16x128xf32, #tpu.memory_space<vmem>>, %arg3: memref<16x128xf32, #tpu.memory_space<vmem>>, %arg4: memref<32x16xbf16, #tpu.memory_space<vmem>>, %arg5: memref<128x128xbf16, #tpu.memory_space<vmem>>, %arg6: memref<128x128xbf16, #tpu.memory_space<vmem>>, %arg7: memref<128x128xbf16, #tpu.memory_space<vmem>>, %arg8: memref<1x1x1xf32, #tpu.memory_space<vmem>>, %arg9: memref<16x128xf32, #tpu.memory_space<vmem>>) attributes {dimension_semantics = [#tpu.dimension_semantics<parallel>, #tpu.dimension_semantics<arbitrary>], iteration_bounds = array<i64: 1, 1>, scalar_prefetch = 0 : i64, scratch_operands = 1 : i64, tpu.core_type = #tpu.core_type<tc>, window_params = [{transform_indices = @transform_0, window_bounds = array<i64: 16, 128>}, {transform_indices = @transform_1, window_bounds = array<i64: 16, 128>}, {pipeline_mode = #tpu.pipeline_mode<synchronous>, transform_indices = @transform_2, window_bounds = array<i64: 32, 16>}, {pipeline_mode = #tpu.pipeline_mode<synchronous>, transform_indices = @transform_3, window_bounds = array<i64: 128, 128>}, {pipeline_mode = #tpu.pipeline_mode<synchronous>, transform_indices = @transform_4, window_bounds = array<i64: 128, 128>}, {pipeline_mode = #tpu.pipeline_mode<synchronous>, transform_indices = @transform_5, window_bounds = array<i64: 128, 128>}, {transform_indices = @transform_6, window_bounds = array<i64: 1, 1, 1>}]} {
    %c0_i32 = arith.constant 0 : i32
    %0 = arith.cmpi eq, %arg1, %c0_i32 : i32
    %1 = arith.extui %0 : i1 to i32
    %c0_i32_0 = arith.constant 0 : i32
    %2 = arith.cmpi ne, %1, %c0_i32_0 : i32
    scf.if %2 {
      %cst_21 = arith.constant 0.000000e+00 : f32
      %33 = vector.broadcast %cst_21 : f32 to vector<16x128xf32>
      %c0_22 = arith.constant 0 : index
      %c0_23 = arith.constant 0 : index
      %34 = vector.load %arg9[%c0_22, %c0_23] : memref<16x128xf32, #tpu.memory_space<vmem>>, vector<16x128xf32>
      tpu.vector_store %arg9[%c0_22, %c0_23], %33 {strides = array<i32>} : memref<16x128xf32, #tpu.memory_space<vmem>>, vector<16x128xf32>,
    } else {
    }
    %c0 = arith.constant 0 : index
    %c0_1 = arith.constant 0 : index
    %3 = vector.load %arg2[%c0, %c0_1] : memref<16x128xf32, #tpu.memory_space<vmem>>, vector<16x128xf32>
    %c0_2 = arith.constant 0 : index
    %c0_3 = arith.constant 0 : index
    %4 = vector.load %arg3[%c0_2, %c0_3] : memref<16x128xf32, #tpu.memory_space<vmem>>, vector<16x128xf32>
    %5 = arith.subf %3, %4 : vector<16x128xf32>
    %6 = arith.truncf %5 : vector<16x128xf32> to vector<16x128xbf16>
    %c0_4 = arith.constant 0 : index
    %c0_5 = arith.constant 0 : index
    %7 = vector.load %arg4[%c0_4, %c0_5] : memref<32x16xbf16, #tpu.memory_space<vmem>>, vector<32x16xbf16>
    %cst = arith.constant dense<0.000000e+00> : vector<32x128xf32>
    %8 = tpu.matmul %7, %6, %cst {dimension_numbers = #tpu.dot_dimension_numbers<[1], [0], [0], [1], [0, 0, 1, 1], [], []>} : vector<32x16xbf16>, vector<16x128xbf16>, vector<32x128xf32> -> vector<32x128xf32>
    %9 = vector.extract_strided_slice %8 {offsets = [0, 0], sizes = [16, 128], strides = [1, 1]} : vector<32x128xf32> to vector<16x128xf32>
    %10 = vector.extract_strided_slice %8 {offsets = [16, 0], sizes = [16, 128], strides = [1, 1]} : vector<32x128xf32> to vector<16x128xf32>
    %11 = arith.truncf %9 : vector<16x128xf32> to vector<16x128xbf16>
    %12 = arith.truncf %10 : vector<16x128xf32> to vector<16x128xbf16>
    %13 = arith.addf %9, %10 : vector<16x128xf32>
    %14 = arith.truncf %13 : vector<16x128xf32> to vector<16x128xbf16>
    %c0_6 = arith.constant 0 : index
    %c0_7 = arith.constant 0 : index
    %15 = vector.load %arg5[%c0_6, %c0_7] : memref<128x128xbf16, #tpu.memory_space<vmem>>, vector<128x128xbf16>
    %cst_8 = arith.constant dense<0.000000e+00> : vector<16x128xf32>
    %16 = tpu.matmul %11, %15, %cst_8 {dimension_numbers = #tpu.dot_dimension_numbers<[1], [0], [0], [1], [0, 0, 1, 1], [], []>} : vector<16x128xbf16>, vector<128x128xbf16>, vector<16x128xf32> -> vector<16x128xf32>
    %c0_9 = arith.constant 0 : index
    %c0_10 = arith.constant 0 : index
    %17 = vector.load %arg6[%c0_9, %c0_10] : memref<128x128xbf16, #tpu.memory_space<vmem>>, vector<128x128xbf16>
    %cst_11 = arith.constant dense<0.000000e+00> : vector<16x128xf32>
    %18 = tpu.matmul %12, %17, %cst_11 {dimension_numbers = #tpu.dot_dimension_numbers<[1], [0], [0], [1], [0, 0, 1, 1], [], []>} : vector<16x128xbf16>, vector<128x128xbf16>, vector<16x128xf32> -> vector<16x128xf32>
    %c0_12 = arith.constant 0 : index
    %c0_13 = arith.constant 0 : index
    %19 = vector.load %arg7[%c0_12, %c0_13] : memref<128x128xbf16, #tpu.memory_space<vmem>>, vector<128x128xbf16>
    %cst_14 = arith.constant dense<0.000000e+00> : vector<16x128xf32>
    %20 = tpu.matmul %14, %19, %cst_14 {dimension_numbers = #tpu.dot_dimension_numbers<[1], [0], [0], [1], [0, 0, 1, 1], [], []>} : vector<16x128xbf16>, vector<128x128xbf16>, vector<16x128xf32> -> vector<16x128xf32>
    %21 = arith.subf %16, %18 : vector<16x128xf32>
    %22 = arith.subf %20, %16 : vector<16x128xf32>
    %23 = arith.subf %22, %18 : vector<16x128xf32>
    %c0_15 = arith.constant 0 : index
    %c0_16 = arith.constant 0 : index
    %24 = vector.load %arg9[%c0_15, %c0_16] : memref<16x128xf32, #tpu.memory_space<vmem>>, vector<16x128xf32>
    %25 = math.absf %21 : vector<16x128xf32>
    %26 = math.absf %23 : vector<16x128xf32>
    %27 = arith.addf %25, %26 : vector<16x128xf32>
    %28 = arith.addf %24, %27 : vector<16x128xf32>
    %c0_17 = arith.constant 0 : index
    %c0_18 = arith.constant 0 : index
    %29 = vector.load %arg9[%c0_17, %c0_18] : memref<16x128xf32, #tpu.memory_space<vmem>>, vector<16x128xf32>
    tpu.vector_store %arg9[%c0_17, %c0_18], %28 {strides = array<i32>} : memref<16x128xf32, #tpu.memory_space<vmem>>, vector<16x128xf32>,
    %c0_i32_19 = arith.constant 0 : i32
    %30 = arith.cmpi eq, %arg1, %c0_i32_19 : i32
    %31 = arith.extui %30 : i1 to i32
    %c0_i32_20 = arith.constant 0 : i32
    %32 = arith.cmpi ne, %31, %c0_i32_20 : i32
    scf.if %32 {
      %c0_21 = arith.constant 0 : index
      %c0_22 = arith.constant 0 : index
      %33 = vector.load %arg9[%c0_21, %c0_22] : memref<16x128xf32, #tpu.memory_space<vmem>>, vector<16x128xf32>
      %34 = vector.shape_cast %33 : vector<16x128xf32> to vector<1x16x128xf32>
      %cst_23 = arith.constant dense<0.000000e+00> : vector<1xf32>
      %35 = vector.multi_reduction <add>, %34, %cst_23 [1, 2] : vector<1x16x128xf32> to vector<1xf32>
      %36 = vector.shape_cast %35 : vector<1xf32> to vector<1x1x1xf32>
      %37 = vector.extract %36[0, 0, 0] : f32 from vector<1x1x1xf32>
      %cst_24 = arith.constant 2.44140625E-4 : f32
      %38 = arith.mulf %37, %cst_24 : f32
      %39 = vector.broadcast %38 : f32 to vector<1x1x1xf32>
      %c0_25 = arith.constant 0 : index
      %c0_26 = arith.constant 0 : index
      %c0_27 = arith.constant 0 : index
      %40 = vector.load %arg8[%c0_25, %c0_26, %c0_27] : memref<1x1x1xf32, #tpu.memory_space<vmem>>, vector<1x1x1xf32>
      tpu.vector_store %arg8[%c0_25, %c0_26, %c0_27], %39 {strides = array<i32>} : memref<1x1x1xf32, #tpu.memory_space<vmem>>, vector<1x1x1xf32>,
    } else {
    }
    return
  }
  func.func @transform_0(%arg0: i32, %arg1: i32) -> (i32, i32) {
    %c1_i32 = arith.constant 1 : i32
    %0 = arith.muli %arg0, %c1_i32 : i32
    %1 = arith.addi %0, %arg1 : i32
    %c0_i32 = arith.constant 0 : i32
    %c0_i32_0 = arith.constant 0 : i32
    return %c0_i32, %1 : i32, i32
  }
  func.func @transform_1(%arg0: i32, %arg1: i32) -> (i32, i32) {
    %c1_i32 = arith.constant 1 : i32
    %0 = arith.muli %arg0, %c1_i32 : i32
    %1 = arith.addi %0, %arg1 : i32
    %c0_i32 = arith.constant 0 : i32
    %c0_i32_0 = arith.constant 0 : i32
    return %c0_i32, %1 : i32, i32
  }
  func.func @transform_2(%arg0: i32, %arg1: i32) -> (i32, i32) {
    %c0_i32 = arith.constant 0 : i32
    %c0_i32_0 = arith.constant 0 : i32
    %c0_i32_1 = arith.constant 0 : i32
    return %c0_i32, %c0_i32_0 : i32, i32
  }
  func.func @transform_3(%arg0: i32, %arg1: i32) -> (i32, i32) {
    %c0_i32 = arith.constant 0 : i32
    %c0_i32_0 = arith.constant 0 : i32
    %c0_i32_1 = arith.constant 0 : i32
    return %c0_i32, %c0_i32_0 : i32, i32
  }
  func.func @transform_4(%arg0: i32, %arg1: i32) -> (i32, i32) {
    %c0_i32 = arith.constant 0 : i32
    %c0_i32_0 = arith.constant 0 : i32
    %c0_i32_1 = arith.constant 0 : i32
    return %c0_i32, %c0_i32_0 : i32, i32
  }
  func.func @transform_5(%arg0: i32, %arg1: i32) -> (i32, i32) {
    %c0_i32 = arith.constant 0 : i32
    %c0_i32_0 = arith.constant 0 : i32
    %c0_i32_1 = arith.constant 0 : i32
    return %c0_i32, %c0_i32_0 : i32, i32
  }
  func.func @transform_6(%arg0: i32, %arg1: i32) -> (i32, i32, i32) {
    %c0_i32 = arith.constant 0 : i32
    %c0_i32_0 = arith.constant 0 : i32
    %c0_i32_1 = arith.constant 0 : i32
    return %arg0, %c0_i32, %c0_i32_0 : i32, i32, i32
  }
}

</mosaic_0001>

<bundles_post_ra>
// kernel: tpu_custom_call.1
= control target key start
LH: loop header
LB: loop body
LE: loop exit
PB: predicated region body
PF: predicated region fallthrough
CT: control target
= control target key end

     0   :  { %11 = vsyncpa [#allocation4], 0  ;;  %s1009_s0 = inlined_call_operand.vmem [shape: f32[16,128], index: 0, kind: input, shape index: {}]   ;;  %s1010_s1 = inlined_call_operand.hbm [shape: f32[16,128], index: 1, kind: input, shape index: {}]   ;;  %s1011_s2 = inlined_call_operand.vmem [shape: bf16[32,16], index: 2, kind: input, shape index: {}]   ;;  %s1012_s3 = inlined_call_operand.hbm [shape: bf16[128,128], index: 3, kind: input, shape index: {}]   ;;  %s1013_s4 = inlined_call_operand.hbm [shape: bf16[128,128], index: 4, kind: input, shape index: {}]   ;;  %s1014_s5 = inlined_call_operand.hbm [shape: bf16[128,128], index: 5, kind: input, shape index: {}]   ;;  %s1015_s6 = inlined_call_operand.hbm [shape: f32[1,1,1], index: 6, kind: output, shape index: {}]  }
   0x1   :  { %12 = vsyncpa [#allocation7], 0 }
   0x2   :  { %13 = vsyncpa [#allocation10], 0 }
   0x3   :  { %14 = vsyncpa [#allocation5], 0  ;;  %s845_s21 = smov [#allocation6]   ;;  %s727_s25 = scalar_lea.hbm %s1012_s3, 1024 }
   0x4   :  { %s45_s22 = sshll.u32 %s845_s21, 4  ;;  %p728_p0 = scmp.ne.s32.totalorder %s1012_s3, %s727_s25  ;;  %s46_s22 = int_to_ptr.vmem [resolvable:$true] %s45_s22 }
   0x5   :  { %p731_p1 = scmp.lt.u32.totalorder %s727_s25, %s1012_s3 }
   0x7   :  { %p733_p2 = pnand %p731_p1, %p728_p0 }
   0x9   :  { %736 = shalt.err (!%p733_p2)
}
   0xa   :  { %s737_s30 = scalar_lea.vmem %s46_s22, 1024  ;;  %p742_p4 = scmp.lt.s32.totalorder %s46_s22, %s46_s22 }
   0xb   :  { %p738_p3 = scmp.ne.s32.totalorder %s46_s22, %s737_s30  ;;  %p743_p5 = scmp.lt.s32.totalorder %s737_s30, %s737_s30 }
   0xd   :  { %p744_p6 = por %p743_p5, %p742_p4 }
   0xf   :  { %p745_p7 = pnand %p744_p6, %p738_p3 }
  0x11   :  { %748 = shalt.err (!%p745_p7)
}
  0x12   :  { %s846_s7 = smov 64   ;;  %s847_s8 = smov 4  }
  0x13   :  { %51 = dma.hbm_to_vmem [thread:$0]  %s1012_s3, 1024, %s46_s22, [#allocation7], %s846_s7, %s846_s7, %s847_s8  }
  0x14   :  { %s848_s11 = smov [#allocation3]   ;;  %s749_s15 = scalar_lea.hbm %s1010_s1, 256 }
  0x15   :  { %s31_s12 = sshll.u32 %s848_s11, 4  ;;  %p750_p8 = scmp.ne.s32.totalorder %s1010_s1, %s749_s15  ;;  %s32_s12 = int_to_ptr.vmem [resolvable:$true] %s31_s12 }
  0x16   :  { %p753_p9 = scmp.lt.u32.totalorder %s749_s15, %s1010_s1 }
  0x18   :  { %p755_p10 = pnand %p753_p9, %p750_p8 }
  0x1a   :  { %758 = shalt.err (!%p755_p10)
}
  0x1b   :  { %s759_s20 = scalar_lea.vmem %s32_s12, 256  ;;  %p764_p12 = scmp.lt.s32.totalorder %s32_s12, %s32_s12 }
  0x1c   :  { %p760_p11 = scmp.ne.s32.totalorder %s32_s12, %s759_s20  ;;  %p765_p13 = scmp.lt.s32.totalorder %s759_s20, %s759_s20 }
  0x1e   :  { %p766_p0 = por %p765_p13, %p764_p12 }
  0x20   :  { %p767_p1 = pnand %p766_p0, %p760_p11 }
  0x22   :  { %770 = shalt.err (!%p767_p1)
}
  0x23   :  { %s849_s3 = smov 128   ;;  %s850_s21 = smov 8  }
  0x24   :  { %37 = dma.hbm_to_vmem [thread:$0]  %s1010_s1, 256, %s32_s12, [#allocation4], %s849_s3, %s849_s3, %s850_s21  }
  0x25   :  { %s851_s24 = smov [#allocation8]   ;;  %s852_s26 = smov [#allocation9]  }
  0x26   :  { %s57_s25 = sshll.u32 %s851_s24, 4  ;;  %s69_s27 = sshll.u32 %s852_s26, 4  ;;  %s58_s25 = int_to_ptr.vmem [resolvable:$true] %s57_s25  ;;  %s918_s27 = int_to_ptr.vmem [resolvable:$true] %s69_s27 }
  0x27   :  { %s771_s30 = scalar_lea.hbm %s1013_s4, 1024 }
  0x28   :  { %p772_p2 = scmp.ne.s32.totalorder %s1013_s4, %s771_s30  ;;  %p775_p3 = scmp.lt.u32.totalorder %s771_s30, %s1013_s4 }
  0x2a   :  { %p777_p4 = pnand %p775_p3, %p772_p2 }
  0x2c   :  { %780 = shalt.err (!%p777_p4)
}
  0x2d   :  { %s781_s1 = scalar_lea.vmem %s58_s25, 1024  ;;  %p786_p6 = scmp.lt.s32.totalorder %s58_s25, %s58_s25 }
  0x2e   :  { %p782_p5 = scmp.ne.s32.totalorder %s58_s25, %s781_s1  ;;  %p787_p7 = scmp.lt.s32.totalorder %s781_s1, %s781_s1 }
  0x30   :  { %p788_p8 = por %p787_p7, %p786_p6 }
  0x32   :  { %p789_p9 = pnand %p788_p8, %p782_p5 }
  0x34   :  { %792 = shalt.err (!%p789_p9)
}
  0x35   :  { %63 = dma.hbm_to_vmem [thread:$0]  %s1013_s4, 1024, %s58_s25, [#allocation7], %s846_s7, %s846_s7, %s847_s8  }
  0x36   :  { %s793_s17 = scalar_lea.hbm %s1014_s5, 1024 }
  0x37   :  { %p794_p10 = scmp.ne.s32.totalorder %s1014_s5, %s793_s17  ;;  %p797_p11 = scmp.lt.u32.totalorder %s793_s17, %s1014_s5 }
  0x39   :  { %p799_p12 = pnand %p797_p11, %p794_p10 }
  0x3b   :  { %802 = shalt.err (!%p799_p12)
}
  0x3c   :  { %s803_s21 = scalar_lea.vmem %s918_s27, 1024  ;;  %p808_p0 = scmp.lt.s32.totalorder %s918_s27, %s918_s27 }
  0x3d   :  { %p804_p13 = scmp.ne.s32.totalorder %s918_s27, %s803_s21  ;;  %p809_p1 = scmp.lt.s32.totalorder %s803_s21, %s803_s21 }
  0x3f   :  { %p810_p2 = por %p809_p1, %p808_p0 }
  0x41   :  { %p811_p3 = pnand %p810_p2, %p804_p13 }
  0x43   :  { %814 = shalt.err (!%p811_p3)
}
  0x44   :  { %75 = dma.hbm_to_vmem [thread:$0]  %s1014_s5, 1024, %s918_s27, [#allocation10], %s846_s7, %s846_s7, %s847_s8  }
  0x45   :  { %837 = dma.done.wait [#allocation4], 256  }
  0x46   :  { %838 = vsyncadd [#allocation4], 4294967040 }
  0x47   :  { %839 = dma.done.wait [#allocation7], 2048  }
  0x48   :  { %840 = vsyncadd [#allocation7], 4294965248 }
  0x49   :  { %841 = dma.done.wait [#allocation10], 1024  }
  0x4a   :  { %842 = vsyncadd [#allocation10], 4294966272  ;;  %v853_v0 = vmov 0.0   ;;  %v107_v1 = vld [vmem:[%s1009_s0] sm:$0xff]  ;;  %v108_v2 = vld [vmem:[%s1009_s0 + $0x8] sm:$0xff]  ;;  %vm128_vm0 = vcmask 130048  }
  0x4b   :  { %628 = vmatprep.subr.bf16.mxu1 %v853_v0  ;;  %v109_v3 = vld [vmem:[#allocation3] sm:$0xff]  ;;  %v110_v4 = vld [vmem:[#allocation3 + $0x8] sm:$0xff]  ;;  %v703_v9 = vld [vmem:[#allocation6] sm:$0xff]   ;;  %vm854_vm1 = vmmov 0   ;;  %s855_s0 = smov [#allocation11]   ;;  %vm539_vm2 = vcmask 0  }
  0x4c   :  { %v111_v5 = vsub.f32 %v107_v1, %v109_v3  ;;  %v112_v6 = vsub.f32 %v108_v2, %v110_v4  ;;  %v701_v7 = vld [vmem:[%s1011_s2] sm:$0xff]   ;;  %v702_v10 = vld [vmem:[%s1011_s2 + $0x8] sm:$0xff]   ;;  %629 = vmatpush3.bf16.msra.mxu1 %v703_v9  ;;  %v705_v11 = vld [vmem:[#allocation6 + $0x8] sm:$0xff]   ;;  %644 = vmatprep.mubr.msk.bf16.mxu1 %vm854_vm1, %v853_v0  ;;  %s547_s2 = sshll.u32 %s855_s0, 4  ;;  %s548_s2 = int_to_ptr.vmem [resolvable:$true] %s547_s2 }
  0x4d   :  { %624 = vmatprep.mubr.msk.bf16.mxu0 %vm128_vm0, %v701_v7  ;;  %v704_v12 = vld [vmem:[#allocation8] sm:$0xff]   ;;  %630 = vmatprep.subr.bf16.mxu1 %v853_v0  ;;  %v707_v13 = vld [vmem:[#allocation6 + $0x10] sm:$0xff]   ;;  %v706_v14 = vld [vmem:[#allocation8 + $0x8] sm:$0xff]   ;;  %s815_s30 = scalar_lea.vmem %s548_s2, 16  ;;  %s819_s9 = scalar_lea.vmem %s548_s2, 32 }
  0x4e   :  { %v113_v8 = vpack.c.bf16 %v112_v6, %v111_v5  ;;  %v709_v15 = vld [vmem:[#allocation6 + $0x18] sm:$0xff]   ;;  %v708_v16 = vld [vmem:[#allocation8 + $0x10] sm:$0xff]   ;;  %v711_v18 = vld [vmem:[#allocation6 + $0x20] sm:$0xff]   ;;  %p816_p4 = scmp.ne.s32.totalorder %s548_s2, %s815_s30  ;;  %p820_p5 = scmp.lt.s32.totalorder %s548_s2, %s548_s2 }
  0x4f   :  { %v710_v17 = vld [vmem:[#allocation8 + $0x18] sm:$0xff]   ;;  %v713_v19 = vld [vmem:[#allocation6 + $0x28] sm:$0xff]   ;;  %v712_v20 = vld [vmem:[#allocation8 + $0x20] sm:$0xff]   ;;  %p821_p6 = scmp.lt.s32.totalorder %s819_s9, %s815_s30 }
  0x50   :  { %622 = vmatprep.subr.bf16.mxu0 %v113_v8  ;;  %631 = vmatpush3.bf16.msra.mxu1 %v705_v11  ;;  %v715_v21 = vld [vmem:[#allocation6 + $0x30] sm:$0xff]   ;;  %v714_v22 = vld [vmem:[#allocation8 + $0x28] sm:$0xff]   ;;  %v717_v24 = vld [vmem:[#allocation6 + $0x38] sm:$0xff]  }
  0x51   :  { %623 = vmatpush3.bf16.msra.mxu0 %v113_v8  ;;  %632 = vmatprep.subr.bf16.mxu1 %v853_v0  ;;  %v716_v23 = vld [vmem:[#allocation8 + $0x30] sm:$0xff]   ;;  %v718_v25 = vld [vmem:[#allocation8 + $0x38] sm:$0xff]   ;;  %v719_v32 = vld [vmem:[#allocation9] sm:$0xff]   ;;  %p822_p7 = por %p821_p6, %p820_p5 }
  0x52   :  { %648 = vmatprep.subr.bf16.mxu0 %v853_v0  ;;  %v720_v36 = vld [vmem:[#allocation9 + $0x8] sm:$0xff]   ;;  %v721_v37 = vld [vmem:[#allocation9 + $0x10] sm:$0xff]   ;;  %v722_v38 = vld [vmem:[#allocation9 + $0x18] sm:$0xff]  }
  0x53   :  { %v723_v39 = vld [vmem:[#allocation9 + $0x20] sm:$0xff]   ;;  %v724_v40 = vld [vmem:[#allocation9 + $0x28] sm:$0xff]   ;;  %v725_v41 = vld [vmem:[#allocation9 + $0x30] sm:$0xff]   ;;  %p823_p8 = pnand %p822_p7, %p816_p4 }
  0x54   :  { %625 = vmatmul.mubr.msk.bf16.vlgmr.msra.gmra.mrb[0].mxu0 %vm128_vm0, %v702_v10  ;;  %633 = vmatpush3.bf16.msra.mxu1 %v707_v13  ;;  %v726_v42 = vld [vmem:[#allocation9 + $0x38] sm:$0xff]  }
  0x55   :  { %649 = vmatpush3.bf16.msra.mxu0 %v704_v12  ;;  %634 = vmatprep.subr.bf16.mxu1 %v853_v0 }
  0x56   :  { %650 = vmatprep.subr.bf16.mxu0 %v853_v0  ;;  %664 = vmatprep.mubr.msk.bf16.mxu0 %vm854_vm1, %v853_v0 }
  0x58   :  { %635 = vmatpush3.bf16.msra.mxu1 %v709_v15 }
  0x59   :  { %651 = vmatpush3.bf16.msra.mxu0 %v706_v14  ;;  %636 = vmatprep.subr.bf16.mxu1 %v853_v0 }
  0x5a   :  { %652 = vmatprep.subr.bf16.mxu0 %v853_v0 }
  0x5c   :  { %637 = vmatpush3.bf16.msra.mxu1 %v711_v18 }
  0x5d   :  { %653 = vmatpush3.bf16.msra.mxu0 %v708_v16  ;;  %638 = vmatprep.subr.bf16.mxu1 %v853_v0 }
  0x5e   :  { %654 = vmatprep.subr.bf16.mxu0 %v853_v0 }
  0x60   :  { %639 = vmatpush3.bf16.msra.mxu1 %v713_v19 }
  0x61   :  { %655 = vmatpush3.bf16.msra.mxu0 %v710_v17  ;;  %640 = vmatprep.subr.bf16.mxu1 %v853_v0 }
  0x62   :  { %656 = vmatprep.subr.bf16.mxu0 %v853_v0 }
  0x64   :  { %641 = vmatpush3.bf16.msra.mxu1 %v715_v21 }
  0x65   :  { %657 = vmatpush3.bf16.msra.mxu0 %v712_v20  ;;  %642 = vmatprep.subr.bf16.mxu1 %v853_v0 }
  0x66   :  { %658 = vmatprep.subr.bf16.mxu0 %v853_v0 }
  0x68   :  { %643 = vmatpush3.bf16.msra.mxu1 %v717_v24 }
  0x69   :  { %659 = vmatpush3.bf16.msra.mxu0 %v714_v22  ;;  %668 = vmatprep.subr.bf16.mxu1 %v853_v0 }
  0x6a   :  { %660 = vmatprep.subr.bf16.mxu0 %v853_v0 }
  0x6d   :  { %661 = vmatpush3.bf16.msra.mxu0 %v716_v23 }
  0x6e   :  { %662 = vmatprep.subr.bf16.mxu0 %v853_v0 }
  0x71   :  { %663 = vmatpush3.bf16.msra.mxu0 %v718_v25 }
 0x127   :  { %v626_v26 = vpop.f32.mrb[0].mxu0 }
 0x128   :  { %v169_v27 = vpop.f32.mrb[1].mxu0 }
 0x129   :  { %v186_v28 = vadd.f32 %v626_v26, %v169_v27  ;;  %v627_v29 = vpop.f32.mrb[2].mxu0 }
 0x12a   :  { %v185_v30 = vpack.c.bf16 %v627_v29, %v626_v26  ;;  %v172_v31 = vpop.f32.mrb[3].mxu0 }
 0x12b   :  { %v184_v33 = vpack.c.bf16 %v172_v31, %v169_v27  ;;  %v187_v34 = vadd.f32 %v627_v29, %v172_v31 }
 0x12c   :  { %665 = vmatmul.mubr.bf16.vlgmr.msra.gmra.mrb[4].mxu0 %v185_v30 }
 0x12d   :  { %v188_v35 = vpack.c.bf16 %v187_v34, %v186_v28  ;;  %645 = vmatmul.mubr.bf16.vlgmr.msra.gmra.mrb[0].mxu1 %v184_v33 }
 0x12e   :  { %669 = vmatpush3.bf16.msra.mxu1 %v719_v32  ;;  %684 = vmatprep.mubr.msk.bf16.mxu1 %vm854_vm1, %v853_v0 }
 0x12f   :  { %670 = vmatprep.subr.bf16.mxu1 %v853_v0 }
 0x132   :  { %671 = vmatpush3.bf16.msra.mxu1 %v720_v36 }
 0x133   :  { %672 = vmatprep.subr.bf16.mxu1 %v853_v0 }
 0x136   :  { %673 = vmatpush3.bf16.msra.mxu1 %v721_v37 }
 0x137   :  { %674 = vmatprep.subr.bf16.mxu1 %v853_v0 }
 0x13a   :  { %675 = vmatpush3.bf16.msra.mxu1 %v722_v38 }
 0x13b   :  { %676 = vmatprep.subr.bf16.mxu1 %v853_v0 }
 0x13e   :  { %677 = vmatpush3.bf16.msra.mxu1 %v723_v39 }
 0x13f   :  { %678 = vmatprep.subr.bf16.mxu1 %v853_v0 }
 0x142   :  { %679 = vmatpush3.bf16.msra.mxu1 %v724_v40 }
 0x143   :  { %680 = vmatprep.subr.bf16.mxu1 %v853_v0 }
 0x146   :  { %681 = vmatpush3.bf16.msra.mxu1 %v725_v41 }
 0x147   :  { %682 = vmatprep.subr.bf16.mxu1 %v853_v0 }
 0x14a   :  { %683 = vmatpush3.bf16.msra.mxu1 %v726_v42 }
 0x14d   :  { %685 = vmatmul.mubr.bf16.vlgmr.msra.gmra.mrb[4].mxu1 %v188_v35 }
 0x1ff   :  { %v392_v43 = vpop.f32.mrb[4].mxu0 }
 0x200   :  { %v287_v44 = vpop.f32.mrb[0].mxu1  ;;  %v666_v45 = vpop.f32.mrb[5].mxu0 }
 0x201   :  { %v504_v46 = vsub.f32 %v287_v44, %v392_v43  ;;  %v646_v47 = vpop.f32.mrb[1].mxu1  ;;  %v395_v48 = vpop.f32.mrb[6].mxu0 }
 0x202   :  { %v290_v49 = vpop.f32.mrb[2].mxu1  ;;  %v667_v50 = vpop.f32.mrb[7].mxu0 }
 0x203   :  { %v505_v51 = vsub.f32 %v290_v49, %v395_v48  ;;  %v647_v52 = vpop.f32.mrb[3].mxu1  ;;  %v512_v60 = vand.u32 2147483647, %v504_v46 }
 0x205   :  { %v513_v63 = vand.u32 2147483647, %v505_v51 }
 0x220   :  { %v497_v53 = vpop.f32.mrb[4].mxu1 }
 0x221   :  { %v506_v54 = vsub.f32 %v497_v53, %v287_v44  ;;  %v686_v55 = vpop.f32.mrb[5].mxu1 }
 0x222   :  { %v500_v56 = vpop.f32.mrb[6].mxu1 }
 0x223   :  { %v508_v57 = vsub.f32 %v506_v54, %v392_v43  ;;  %v507_v58 = vsub.f32 %v500_v56, %v290_v49  ;;  %v687_v59 = vpop.f32.mrb[7].mxu1 }
 0x225   :  { %v514_v61 = vand.u32 2147483647, %v508_v57  ;;  %v509_v62 = vsub.f32 %v507_v58, %v395_v48 }
 0x227   :  { %v515_v0 = vand.u32 2147483647, %v509_v62  ;;  %v516_v1 = vadd.f32 %v514_v61, %v512_v60 }
 0x229   :  { %v517_v2 = vadd.f32 %v515_v0, %v513_v63 }
 0x22b   :  { %v527_v3 = vadd.f32 %v517_v2, %v516_v1 }
 0x22d   :  { %528 = vadd.xlane.f32.xlu0 %v527_v3 }
 0x2ba   :  { %v529_v4 = vpop.xlane.xlu0 %528 }
 0x2bb   :  { %v530_v5 = vrot.slane %v529_v4, 4 }
 0x2bd   :  { %v531_v6 = vadd.f32 %v530_v5, %v529_v4 }
 0x2bf   :  { %v532_v7 = vrot.slane %v531_v6, 2 }
 0x2c1   :  { %v533_v8 = vadd.f32 %v532_v7, %v531_v6 }
 0x2c3   :  { %v534_v9 = vrot.slane %v533_v8, 1 }
 0x2c5   :  { %v535_v10 = vadd.f32 %v534_v9, %v533_v8 }
 0x2c7   :  { %688 = vpush %v535_v10 }
 0x2f8   :  { %s689_s28 = spop %688 }
 0x2f9   :  { %s537_s29 = smul.f32 0.00024414063, %s689_s28 }
 0x2fb   :  { %v538_v11 = vstv %s537_s29 }
 0x2fc   :  { %540 = vst.msk [vmem:[#allocation11] sm:$0x1] %vm539_vm2, %v538_v11 }
 0x2fd   :  { %826 = shalt.err (!%p823_p8)
}
 0x2fe   :  { %s827_s13 = scalar_lea.hbm %s1015_s6, 16 }
 0x2ff   :  { %p828_p9 = scmp.ne.s32.totalorder %s1015_s6, %s827_s13  ;;  %p831_p10 = scmp.lt.u32.totalorder %s827_s13, %s1015_s6 }
 0x301   :  { %p833_p11 = pnand %p831_p10, %p828_p9 }
 0x303   :  { %836 = shalt.err (!%p833_p11)
}
 0x304   :  { %550 = dma.vmem_to_hbm [thread:$0]  %s548_s2, 16, %s1015_s6, [#allocation5]  }
 0x305   :  { %843 = dma.done.wait [#allocation5], 16  }
 0x306   :  { %844 = vsyncadd [#allocation5], 4294967280 }
 0x307   :  { %554 = vsyncpa [#allocation4], 1 }
 0x308   :  { %555 = vsyncpa [#allocation7], 1 }
 0x309   :  { %556 = vsyncpa [#allocation10], 1 }
 0x30a   :  { %557 = vsyncpa [#allocation5], 1 }

</bundles_post_ra>
